<compile_context>
chip_gen: v7x
topology: tpu7x:2x2x1
jax: 0.10.0
libtpu: 0.0.40
codegen_flags: <defaults>
</compile_context>

<pallas_src>
import functools

import jax
import jax.numpy as jnp
from jax.experimental import pallas as pl
from jax.experimental.pallas import tpu as pltpu


def _round_up(x, m):
    return ((x + m - 1) // m) * m


def _random_topk_kernel(bits_ref, indices_ref, *, num_selects, idx_bits):
    """Pick `num_selects` distinct random experts per token (per column).

    bits_ref    : (num_experts, TB) uint32 random bits   (token axis on lanes)
    indices_ref : (num_selects, TB) int32 selected expert ids
    """
    idx_mask = (1 << idx_bits) - 1
    clear_mask = (~idx_mask) & 0x7FFFFFFF

    bits = bits_ref[...]                                     # (E, TB) uint32
    # Composite integer key: high bits random, low idx_bits = expert id.
    # (bits >> 1) keeps the int32 cast non-negative, so signed max orders the
    # keys correctly and -1 is a safe "already selected" sentinel.
    rnd = (bits >> 1).astype(jnp.int32) & jnp.int32(clear_mask)
    expert = jax.lax.broadcasted_iota(jnp.int32, rnd.shape, 0)
    keys = rnd | expert                                      # (E, TB) int32 >= 0

    for k in range(num_selects):                             # small static loop
        row_max = jnp.max(keys, axis=0, keepdims=True)       # (1, TB): 1 reduce
        indices_ref[pl.ds(k, 1), :] = row_max & jnp.int32(idx_mask)
        # Remove the winner; composite keys are distinct within a column.
        keys = jnp.where(keys == row_max, jnp.int32(-1), keys)


def random_plain_gate(x, num_experts, num_selects, use_softmax=True,
                      key=None, block_batch=8192):
    """Pallas implementation of RandomPlainGate.forward."""
    if key is None:
        key = jax.random.PRNGKey(0)
    batch = x.shape[0]

    # Constant scores: cheap XLA broadcast, kept out of the kernel.
    # (torch code divides by num_experts, not num_selects — we match the code.)
    score_val = (1.0 / num_experts) if use_softmax else 1.0
    scores = jnp.full((batch, num_experts), score_val, dtype=jnp.float32)

    # Lane-dense, grid-friendly token tiling.
    lane = 128
    tb = min(_round_up(block_batch, lane), _round_up(batch, lane))
    padded = _round_up(batch, tb)

    # Random bits from the standard JAX PRNG (works on TPU and in interpret
    # mode); transposed so tokens sit on the lane axis.
    bits = jax.random.bits(key, (num_experts, padded), dtype=jnp.uint32)

    idx_bits = max(1, (num_experts - 1).bit_length())

    kernel = functools.partial(
        _random_topk_kernel, num_selects=num_selects, idx_bits=idx_bits)

    indices_t = pl.pallas_call(
        kernel,
        out_shape=jax.ShapeDtypeStruct((num_selects, padded), jnp.int32),
        grid=(padded // tb,),
        in_specs=[pl.BlockSpec((num_experts, tb), lambda i: (0, i))],
        out_specs=pl.BlockSpec((num_selects, tb), lambda i: (0, i)),
        compiler_params=pltpu.CompilerParams(
            dimension_semantics=("parallel",)),
    )(bits)

    # (num_selects, padded) -> (batch, num_selects); tiny transpose in XLA.
    indices = indices_t[:, :batch].T
    # TODO(synk): torch returns int64 indices; int32 is used here (TPU-native).

    return {
        "topK_indices": indices,
        "topK_scores": scores,
        "balance_loss": jnp.asarray(0, dtype=jnp.int32),
        "load": jnp.asarray(-1, dtype=jnp.int32),
        "importance": jnp.asarray(-1, dtype=jnp.int32),
    }


if __name__ == "__main__":
    # Small shapes consistent with the module: 8 tokens, hidden=32,
    # 8 experts, select 2.
    batch, input_size = 8, 32
    num_experts, num_selects = 8, 2

    root = jax.random.PRNGKey(0)
    x_key, gate_key = jax.random.split(root)
    x = jax.random.normal(x_key, (batch, input_size), dtype=jnp.float32)

    out = random_plain_gate(x, num_experts, num_selects,
                            use_softmax=True, key=gate_key)
    jax.block_until_ready(out)

    scores = out["topK_scores"]
    indices = out["topK_indices"]

    # --- lightweight correctness checks ---
    assert scores.shape == (batch, num_experts)
    assert indices.shape == (batch, num_selects)
    assert bool(jnp.allclose(scores, 1.0 / num_experts)), "bad scores"
    idx_np = jax.device_get(indices)
    assert (idx_np >= 0).all() and (idx_np < num_experts).all(), "index oob"
    for row in idx_np:
        assert len(set(row.tolist())) == num_selects, "duplicate expert in row"
    assert int(out["balance_loss"]) == 0
    assert int(out["load"]) == -1
    assert int(out["importance"]) == -1

    print("KERNEL_OK")
</pallas_src>

<mosaic_0001>
module attributes {stable_mosaic.version = 11 : i64} {
  func.func @_random_topk_kernel(%arg0: i32, %arg1: memref<8x128xi32, #tpu.memory_space<vmem>>, %arg2: memref<2x128xi32, #tpu.memory_space<vmem>>) attributes {dimension_semantics = [#tpu.dimension_semantics<parallel>], iteration_bounds = array<i64: 1>, scalar_prefetch = 0 : i64, scratch_operands = 0 : i64, tpu.core_type = #tpu.core_type<tc>, window_params = [{transform_indices = @transform_0, window_bounds = array<i64: 8, 128>}, {transform_indices = @transform_1, window_bounds = array<i64: 2, 128>}]} {
    %c0 = arith.constant 0 : index
    %c0_0 = arith.constant 0 : index
    %0 = vector.load %arg1[%c0, %c0_0] : memref<8x128xi32, #tpu.memory_space<vmem>>, vector<8x128xi32>
    %c1_i32 = arith.constant 1 : i32
    %1 = vector.broadcast %c1_i32 : i32 to vector<8x128xi32>
    %2 = arith.shrui %0, %1 : vector<8x128xi32>
    %c2147483640_i32 = arith.constant 2147483640 : i32
    %3 = vector.broadcast %c2147483640_i32 : i32 to vector<8x128xi32>
    %4 = arith.andi %2, %3 : vector<8x128xi32>
    %5 = tpu.iota {dimensions = array<i32: 0>} : vector<8x128xi32>
    %6 = arith.ori %4, %5 : vector<8x128xi32>
    %cst = arith.constant dense<-2147483648> : vector<128xi32>
    %7 = vector.multi_reduction <maxsi>, %6, %cst [0] : vector<8x128xi32> to vector<128xi32>
    %8 = vector.shape_cast %7 : vector<128xi32> to vector<1x128xi32>
    %c7_i32 = arith.constant 7 : i32
    %9 = vector.broadcast %c7_i32 : i32 to vector<1x128xi32>
    %10 = arith.andi %8, %9 : vector<1x128xi32>
    %c0_1 = arith.constant 0 : index
    %c0_2 = arith.constant 0 : index
    %11 = vector.load %arg2[%c0_1, %c0_2] : memref<2x128xi32, #tpu.memory_space<vmem>>, vector<1x128xi32>
    tpu.vector_store %arg2[%c0_1, %c0_2], %10 {strides = array<i32>} : memref<2x128xi32, #tpu.memory_space<vmem>>, vector<1x128xi32>,
    %12 = vector.broadcast %8 : vector<1x128xi32> to vector<8x128xi32>
    %13 = arith.cmpi eq, %6, %12 : vector<8x128xi32>
    %c-1_i32 = arith.constant -1 : i32
    %14 = vector.broadcast %c-1_i32 : i32 to vector<8x128xi32>
    %15 = arith.select %13, %14, %6 : vector<8x128xi1>, vector<8x128xi32>
    %cst_3 = arith.constant dense<-2147483648> : vector<128xi32>
    %16 = vector.multi_reduction <maxsi>, %15, %cst_3 [0] : vector<8x128xi32> to vector<128xi32>
    %17 = vector.shape_cast %16 : vector<128xi32> to vector<1x128xi32>
    %c7_i32_4 = arith.constant 7 : i32
    %18 = vector.broadcast %c7_i32_4 : i32 to vector<1x128xi32>
    %19 = arith.andi %17, %18 : vector<1x128xi32>
    %c1 = arith.constant 1 : index
    %c0_5 = arith.constant 0 : index
    %20 = vector.load %arg2[%c1, %c0_5] : memref<2x128xi32, #tpu.memory_space<vmem>>, vector<1x128xi32>
    tpu.vector_store %arg2[%c1, %c0_5], %19 {strides = array<i32>} : memref<2x128xi32, #tpu.memory_space<vmem>>, vector<1x128xi32>,
    return
  }
  func.func @transform_0(%arg0: i32) -> (i32, i32) {
    %c0_i32 = arith.constant 0 : i32
    %c0_i32_0 = arith.constant 0 : i32
    return %c0_i32, %arg0 : i32, i32
  }
  func.func @transform_1(%arg0: i32) -> (i32, i32) {
    %c0_i32 = arith.constant 0 : i32
    %c0_i32_0 = arith.constant 0 : i32
    return %c0_i32, %arg0 : i32, i32
  }
}

</mosaic_0001>

<bundles_post_ra>
// kernel: tpu_custom_call.1
= control target key start
LH: loop header
LB: loop body
LE: loop exit
PB: predicated region body
PF: predicated region fallthrough
CT: control target
= control target key end

     0   :  { %6 = vsyncpa [#allocation3], 0  ;;  %s152_s0 = inlined_call_operand.hbm [shape: u32[8,128], index: 0, kind: input, shape index: {}]   ;;  %s153_s1 = inlined_call_operand.hbm [shape: s32[2,128], index: 1, kind: output, shape index: {}]  }
   0x1   :  { %7 = vsyncpa [#allocation4], 0  ;;  %s116_s6 = smov [#allocation2]   ;;  %s68_s10 = scalar_lea.hbm %s152_s0, 128 }
   0x2   :  { %s14_s7 = sshll.u32 %s116_s6, 4  ;;  %p69_p0 = scmp.ne.s32.totalorder %s152_s0, %s68_s10  ;;  %s15_s7 = int_to_ptr.vmem [resolvable:$true] %s14_s7 }
   0x3   :  { %p72_p1 = scmp.lt.u32.totalorder %s68_s10, %s152_s0 }
   0x5   :  { %p74_p2 = pnand %p72_p1, %p69_p0 }
   0x7   :  { %77 = shalt.err (!%p74_p2)
}
   0x8   :  { %s78_s15 = scalar_lea.vmem %s15_s7, 128  ;;  %p83_p4 = scmp.lt.s32.totalorder %s15_s7, %s15_s7 }
   0x9   :  { %p79_p3 = scmp.ne.s32.totalorder %s15_s7, %s78_s15  ;;  %p84_p5 = scmp.lt.s32.totalorder %s78_s15, %s78_s15 }
   0xb   :  { %p85_p6 = por %p84_p5, %p83_p4 }
   0xd   :  { %p86_p7 = pnand %p85_p6, %p79_p3 }
   0xf   :  { %89 = shalt.err (!%p86_p7)
}
  0x10   :  { %17 = dma.hbm_to_vmem [thread:$0]  %s152_s0, 128, %s15_s7, [#allocation3]  }
  0x11   :  { %112 = dma.done.wait [#allocation3], 128  }
  0x12   :  { %113 = vsyncadd [#allocation3], 4294967168  ;;  %v24_v0 = vlaneseq  ;;  %v21_v1 = vld [vmem:[#allocation2] sm:$0xff]  ;;  %s117_s0 = smov [#allocation5]  }
  0x13   :  { %v22_v2 = vshrl.u32 %v21_v1, 1  ;;  %s57_s18 = sshll.u32 %s117_s0, 4  ;;  %s58_s18 = int_to_ptr.vmem [resolvable:$true] %s57_s18 }
  0x14   :  { %v25_v3 = vshrl.u32 %v24_v0, 7  ;;  %s90_s19 = scalar_lea.vmem %s58_s18, 32  ;;  %p95_p9 = scmp.lt.s32.totalorder %s58_s18, %s58_s18 }
  0x15   :  { %v23_v4 = vand.u32 2147483640, %v22_v2  ;;  %p91_p8 = scmp.ne.s32.totalorder %s58_s18, %s90_s19  ;;  %p96_p10 = scmp.lt.s32.totalorder %s90_s19, %s90_s19 }
  0x17   :  { %v26_v5 = vor.u32 %v25_v3, %v23_v4  ;;  %p97_p11 = por %p96_p10, %p95_p9 }
  0x19   :  { %v27_v6 = vrot.slane %v26_v5, 4  ;;  %p98_p12 = pnand %p97_p11, %p91_p8 }
  0x1b   :  { %vm28_vm0 = vcmp.gt.s32.totalorder %v26_v5, %v27_v6 }
  0x1c   :  { %v29_v7 = vsel %vm28_vm0, %v26_v5, %v27_v6 }
  0x1d   :  { %v30_v8 = vrot.slane %v29_v7, 2 }
  0x1f   :  { %vm31_vm1 = vcmp.gt.s32.totalorder %v29_v7, %v30_v8 }
  0x20   :  { %v32_v9 = vsel %vm31_vm1, %v29_v7, %v30_v8 }
  0x21   :  { %v33_v10 = vrot.slane %v32_v9, 1 }
  0x23   :  { %vm34_vm2 = vcmp.gt.s32.totalorder %v32_v9, %v33_v10 }
  0x24   :  { %v35_v11 = vsel %vm34_vm2, %v32_v9, %v33_v10 }
  0x25   :  { %v36_v12 = vand.u32 7, %v35_v11  ;;  %vm38_vm3 = vcmp.eq.s32.totalorder %v26_v5, %v35_v11 }
  0x26   :  { %v39_v13 = vsel %vm38_vm3, 4294967295, %v26_v5 }
  0x27   :  { %37 = vst [vmem:[#allocation5] sm:$0x1] %v36_v12  ;;  %v40_v14 = vrot.slane %v39_v13, 4 }
  0x29   :  { %vm41_vm4 = vcmp.gt.s32.totalorder %v39_v13, %v40_v14 }
  0x2a   :  { %v42_v15 = vsel %vm41_vm4, %v39_v13, %v40_v14 }
  0x2b   :  { %v43_v16 = vrot.slane %v42_v15, 2 }
  0x2d   :  { %vm44_vm5 = vcmp.gt.s32.totalorder %v42_v15, %v43_v16 }
  0x2e   :  { %v45_v17 = vsel %vm44_vm5, %v42_v15, %v43_v16 }
  0x2f   :  { %v46_v18 = vrot.slane %v45_v17, 1 }
  0x31   :  { %vm47_vm6 = vcmp.gt.s32.totalorder %v45_v17, %v46_v18 }
  0x32   :  { %v48_v19 = vsel %vm47_vm6, %v45_v17, %v46_v18 }
  0x33   :  { %v49_v20 = vand.u32 7, %v48_v19 }
  0x35   :  { %50 = vst [vmem:[#allocation5 + $0x1] sm:$0x1] %v49_v20 }
  0x36   :  { %101 = shalt.err (!%p98_p12)
}
  0x37   :  { %s102_s22 = scalar_lea.hbm %s153_s1, 32 }
  0x38   :  { %p103_p13 = scmp.ne.s32.totalorder %s153_s1, %s102_s22  ;;  %p106_p0 = scmp.lt.u32.totalorder %s102_s22, %s153_s1 }
  0x3a   :  { %p108_p1 = pnand %p106_p0, %p103_p13 }
  0x3c   :  { %111 = shalt.err (!%p108_p1)
}
  0x3d   :  { %60 = dma.vmem_to_hbm [thread:$0]  %s58_s18, 32, %s153_s1, [#allocation4]  }
  0x3e   :  { %114 = dma.done.wait [#allocation4], 32  }
  0x3f   :  { %115 = vsyncadd [#allocation4], 4294967264 }
  0x40   :  { %64 = vsyncpa [#allocation3], 1 }
  0x41   :  { %65 = vsyncpa [#allocation4], 1 }

</bundles_post_ra>
